<compile_context>
chip_gen: v7x
topology: tpu7x:2x2x1
jax: 0.10.0
libtpu: 0.0.40
codegen_flags: <defaults>
</compile_context>

<pallas_src>
import jax
import jax.numpy as jnp
from jax.experimental import pallas as pl
from jax.experimental.pallas import tpu as pltpu

LANE = 128


def _label_predictor_kernel(x_ref, w1_ref, b1_ref, w2_ref, b2_ref, o_ref):
    # x_ref:  (4, TB)  -- features on sublanes, batch on lanes (lane-dense)
    # w1_ref: (8, 4)   -- PyTorch (out, in) layout, VMEM-resident
    # b1_ref: (8, 1)
    # w2_ref: (2, 8)
    # b2_ref: (2, 1)
    # o_ref:  (2, TB)
    xt = x_ref[...]
    # Contractions are tiny (K=4 / K=8); the kernel stays DMA-bound, so the
    # MXU path is fine here (no relayout hot spot observed; if a bundle dump
    # ever shows vxpose staging on the critical path, swap these for unrolled
    # VPU broadcast multiply-adds over the 4/8 weight columns).
    h = jnp.dot(w1_ref[...], xt, preferred_element_type=jnp.float32)       # (8, TB)
    h = jnp.maximum(h + b1_ref[...], 0.0)                                  # ReLU
    logits = jnp.dot(w2_ref[...], h, preferred_element_type=jnp.float32)   # (2, TB)
    o_ref[...] = (logits + b2_ref[...]).astype(o_ref.dtype)


def _choose_tiling(batch, target_tb, min_two_tile_batch=8192):
    """Pick (num_tiles, tb): tb a multiple of 128, padding < 128 cols/tile."""
    batch = max(int(batch), 1)
    num_tiles = max(1, pl.cdiv(batch, target_tb))
    # Give v7x's second TensorCore work once the batch is big enough that the
    # extra grid step's fixed overhead is negligible. Neutral on v5e/v6e.
    if num_tiles == 1 and batch >= min_two_tile_batch:
        num_tiles = 2
    tb = pl.cdiv(pl.cdiv(batch, num_tiles), LANE) * LANE
    return num_tiles, tb


def label_predictor_fm(x_t, w1, b1, w2, b2, *, target_tb=65536,
                       vmem_limit_bytes=None):
    """Feature-major entry point: x_t (4, B) float32 -> logits (2, B).

    Use this directly when the surrounding pipeline keeps activations
    feature-major; it avoids the transpose copies of `label_predictor`.
    """
    F, B = x_t.shape
    assert F == 4 and w1.shape == (8, 4) and w2.shape == (2, 8)

    num_tiles, tb = _choose_tiling(B, target_tb)
    b_pad = num_tiles * tb

    if b_pad != B:
        x_t = jnp.pad(x_t, ((0, 0), (0, b_pad - B)))       # (4, b_pad)

    x_t = x_t.astype(jnp.float32)
    b1_c = b1.reshape(8, 1).astype(jnp.float32)
    b2_c = b2.reshape(2, 1).astype(jnp.float32)

    # ~4 flops/byte -> memory bound; tell XLA roughly what this call costs.
    cost = pl.CostEstimate(
        flops=int(b_pad) * 96,                 # 2*(4*8) + 2*(8*2) per column
        transcendentals=0,
        bytes_accessed=int(b_pad) * 24 + 232,  # x in + logits out + params
    )

    grid_spec = pl.GridSpec(
        grid=(num_tiles,),
        in_specs=[
            pl.BlockSpec((4, tb), lambda i: (0, i)),   # x tile (batch on lanes)
            pl.BlockSpec((8, 4), lambda i: (0, 0)),    # W1 resident
            pl.BlockSpec((8, 1), lambda i: (0, 0)),    # b1 resident
            pl.BlockSpec((2, 8), lambda i: (0, 0)),    # W2 resident
            pl.BlockSpec((2, 1), lambda i: (0, 0)),    # b2 resident
        ],
        out_specs=pl.BlockSpec((2, tb), lambda i: (0, i)),  # lane-dense output
    )

    compiler_params = pltpu.CompilerParams(
        # Independent batch tiles -> shard across v7x's 2 TensorCores.
        dimension_semantics=("parallel",),
        vmem_limit_bytes=vmem_limit_bytes,
    )

    out_t = pl.pallas_call(
        _label_predictor_kernel,
        out_shape=jax.ShapeDtypeStruct((2, b_pad), jnp.float32),
        grid_spec=grid_spec,
        compiler_params=compiler_params,
        cost_estimate=cost,
    )(x_t, w1.astype(jnp.float32), b1_c, w2.astype(jnp.float32), b2_c)

    if b_pad != B:
        out_t = out_t[:, :B]
    return out_t                                            # (2, B)


def label_predictor(x, w1, b1, w2, b2, *, target_tb=65536,
                    vmem_limit_bytes=None):
    """Drop-in adapter matching the PyTorch module: x (B, 4) -> logits (B, 2).

    Prefer `label_predictor_fm` in a feature-major pipeline to avoid the two
    transpose copies this adapter pays on a purely bandwidth-bound op.
    """
    B, F = x.shape
    assert F == 4
    out_t = label_predictor_fm(x.T, w1, b1, w2, b2,
                               target_tb=target_tb,
                               vmem_limit_bytes=vmem_limit_bytes)
    return out_t.T                                          # (B, 2)


def init_params(key):
    """Deterministic init mirroring nn.Linear: W (out, in), b (out,)."""
    k1, k2, k3, k4 = jax.random.split(key, 4)
    lim1 = 1.0 / jnp.sqrt(4.0)
    lim2 = 1.0 / jnp.sqrt(8.0)
    w1 = jax.random.uniform(k1, (8, 4), jnp.float32, -lim1, lim1)
    b1 = jax.random.uniform(k2, (8,), jnp.float32, -lim1, lim1)
    w2 = jax.random.uniform(k3, (2, 8), jnp.float32, -lim2, lim2)
    b2 = jax.random.uniform(k4, (2,), jnp.float32, -lim2, lim2)
    return w1, b1, w2, b2


def _reference(x, w1, b1, w2, b2):
    # Same math as the PyTorch forward: (x @ W.T + b) per layer, ReLU between.
    return jnp.maximum(x @ w1.T + b1, 0.0) @ w2.T + b2


if __name__ == "__main__":
    key = jax.random.PRNGKey(0)
    k_x, k_x2, k_p = jax.random.split(key, 3)
    w1, b1, w2, b2 = init_params(k_p)

    # Small-batch case (single 128-column tile).
    B = 8
    x = jax.random.normal(k_x, (B, 4), jnp.float32)
    out = jax.block_until_ready(label_predictor(x, w1, b1, w2, b2))
    ref = _reference(x, w1, b1, w2, b2)
    assert out.shape == (B, 2)
    assert jnp.allclose(out, ref, atol=1e-5, rtol=1e-5)

    # Multi-tile path (forces 2 tiles) to exercise the batch grid + padding.
    B2 = 300
    x2 = jax.random.normal(k_x2, (B2, 4), jnp.float32)
    out2 = jax.block_until_ready(
        label_predictor(x2, w1, b1, w2, b2, target_tb=256))
    ref2 = _reference(x2, w1, b1, w2, b2)
    assert out2.shape == (B2, 2)
    assert jnp.allclose(out2, ref2, atol=1e-5, rtol=1e-5)

    print("KERNEL_OK")
</pallas_src>

<mosaic_0001>
module attributes {stable_mosaic.version = 11 : i64} {
  func.func @_label_predictor_kernel(%arg0: i32, %arg1: memref<4x128xf32, #tpu.memory_space<vmem>>, %arg2: memref<8x4xf32, #tpu.memory_space<vmem>>, %arg3: memref<8x1xf32, #tpu.memory_space<vmem>>, %arg4: memref<2x8xf32, #tpu.memory_space<vmem>>, %arg5: memref<2x1xf32, #tpu.memory_space<vmem>>, %arg6: memref<2x128xf32, #tpu.memory_space<vmem>>) attributes {dimension_semantics = [#tpu.dimension_semantics<parallel>], iteration_bounds = array<i64: 1>, scalar_prefetch = 0 : i64, scratch_operands = 0 : i64, tpu.core_type = #tpu.core_type<tc>, window_params = [{transform_indices = @transform_0, window_bounds = array<i64: 4, 128>}, {pipeline_mode = #tpu.pipeline_mode<synchronous>, transform_indices = @transform_1, window_bounds = array<i64: 8, 4>}, {pipeline_mode = #tpu.pipeline_mode<synchronous>, transform_indices = @transform_2, window_bounds = array<i64: 8, 1>}, {pipeline_mode = #tpu.pipeline_mode<synchronous>, transform_indices = @transform_3, window_bounds = array<i64: 2, 8>}, {pipeline_mode = #tpu.pipeline_mode<synchronous>, transform_indices = @transform_4, window_bounds = array<i64: 2, 1>}, {transform_indices = @transform_5, window_bounds = array<i64: 2, 128>}]} {
    %c0 = arith.constant 0 : index
    %c0_0 = arith.constant 0 : index
    %0 = vector.load %arg1[%c0, %c0_0] : memref<4x128xf32, #tpu.memory_space<vmem>>, vector<4x128xf32>
    %c0_1 = arith.constant 0 : index
    %c0_2 = arith.constant 0 : index
    %1 = vector.load %arg2[%c0_1, %c0_2] : memref<8x4xf32, #tpu.memory_space<vmem>>, vector<8x4xf32>
    %cst = arith.constant dense<0.000000e+00> : vector<8x128xf32>
    %2 = tpu.matmul %1, %0, %cst {dimension_numbers = #tpu.dot_dimension_numbers<[1], [0], [0], [1], [0, 0, 1, 1], [], []>} : vector<8x4xf32>, vector<4x128xf32>, vector<8x128xf32> -> vector<8x128xf32>
    %c0_3 = arith.constant 0 : index
    %c0_4 = arith.constant 0 : index
    %3 = vector.load %arg3[%c0_3, %c0_4] : memref<8x1xf32, #tpu.memory_space<vmem>>, vector<8x1xf32>
    %4 = vector.broadcast %3 : vector<8x1xf32> to vector<8x128xf32>
    %5 = arith.addf %2, %4 : vector<8x128xf32>
    %cst_5 = arith.constant 0.000000e+00 : f32
    %6 = vector.broadcast %cst_5 : f32 to vector<8x128xf32>
    %7 = arith.maximumf %5, %6 : vector<8x128xf32>
    %c0_6 = arith.constant 0 : index
    %c0_7 = arith.constant 0 : index
    %8 = vector.load %arg4[%c0_6, %c0_7] : memref<2x8xf32, #tpu.memory_space<vmem>>, vector<2x8xf32>
    %cst_8 = arith.constant dense<0.000000e+00> : vector<2x128xf32>
    %9 = tpu.matmul %8, %7, %cst_8 {dimension_numbers = #tpu.dot_dimension_numbers<[1], [0], [0], [1], [0, 0, 1, 1], [], []>} : vector<2x8xf32>, vector<8x128xf32>, vector<2x128xf32> -> vector<2x128xf32>
    %c0_9 = arith.constant 0 : index
    %c0_10 = arith.constant 0 : index
    %10 = vector.load %arg5[%c0_9, %c0_10] : memref<2x1xf32, #tpu.memory_space<vmem>>, vector<2x1xf32>
    %11 = vector.broadcast %10 : vector<2x1xf32> to vector<2x128xf32>
    %12 = arith.addf %9, %11 : vector<2x128xf32>
    %c0_11 = arith.constant 0 : index
    %c0_12 = arith.constant 0 : index
    %13 = vector.load %arg6[%c0_11, %c0_12] : memref<2x128xf32, #tpu.memory_space<vmem>>, vector<2x128xf32>
    tpu.vector_store %arg6[%c0_11, %c0_12], %12 {strides = array<i32>} : memref<2x128xf32, #tpu.memory_space<vmem>>, vector<2x128xf32>,
    return
  }
  func.func @transform_0(%arg0: i32) -> (i32, i32) {
    %c0_i32 = arith.constant 0 : i32
    %c0_i32_0 = arith.constant 0 : i32
    return %c0_i32, %arg0 : i32, i32
  }
  func.func @transform_1(%arg0: i32) -> (i32, i32) {
    %c0_i32 = arith.constant 0 : i32
    %c0_i32_0 = arith.constant 0 : i32
    %c0_i32_1 = arith.constant 0 : i32
    return %c0_i32, %c0_i32_0 : i32, i32
  }
  func.func @transform_2(%arg0: i32) -> (i32, i32) {
    %c0_i32 = arith.constant 0 : i32
    %c0_i32_0 = arith.constant 0 : i32
    %c0_i32_1 = arith.constant 0 : i32
    return %c0_i32, %c0_i32_0 : i32, i32
  }
  func.func @transform_3(%arg0: i32) -> (i32, i32) {
    %c0_i32 = arith.constant 0 : i32
    %c0_i32_0 = arith.constant 0 : i32
    %c0_i32_1 = arith.constant 0 : i32
    return %c0_i32, %c0_i32_0 : i32, i32
  }
  func.func @transform_4(%arg0: i32) -> (i32, i32) {
    %c0_i32 = arith.constant 0 : i32
    %c0_i32_0 = arith.constant 0 : i32
    %c0_i32_1 = arith.constant 0 : i32
    return %c0_i32, %c0_i32_0 : i32, i32
  }
  func.func @transform_5(%arg0: i32) -> (i32, i32) {
    %c0_i32 = arith.constant 0 : i32
    %c0_i32_0 = arith.constant 0 : i32
    return %c0_i32, %arg0 : i32, i32
  }
}

</mosaic_0001>

<bundles_post_ra>
// kernel: tpu_custom_call.1
= control target key start
LH: loop header
LB: loop body
LE: loop exit
PB: predicated region body
PF: predicated region fallthrough
CT: control target
= control target key end

     0   :  { %vm33_vm0 = vcmask 1043456   ;;  %v250_v2 = vmov 0.0   ;;  %vm251_vm1 = vmmov 0   ;;  %vm29_vm2 = vcmask 31744   ;;  %s311_s0 = inlined_call_operand.vmem [shape: f32[4,128], index: 0, kind: input, shape index: {}]   ;;  %s312_s1 = inlined_call_operand.vmem [shape: f32[8,4], index: 1, kind: input, shape index: {}]   ;;  %s313_s2 = inlined_call_operand.vmem [shape: f32[8,1], index: 2, kind: input, shape index: {}]   ;;  %s314_s3 = inlined_call_operand.vmem [shape: f32[2,8], index: 3, kind: input, shape index: {}]   ;;  %s315_s4 = inlined_call_operand.vmem [shape: f32[2,1], index: 4, kind: input, shape index: {}]   ;;  %s316_s5 = inlined_call_operand.hbm [shape: f32[2,128], index: 5, kind: output, shape index: {}]  }
   0x1   :  { %v21_v0 = vld [vmem:[%s311_s0] sm:$0xf]  ;;  %211 = vmatprep.subr.mxu0 %v250_v2  ;;  %213 = vmatprep.mubr.msk.f32.mxu0 %vm251_vm1, %v250_v2  ;;  %v252_v4 = vmov 0  }
   0x2   :  { %v22_v1 = vld [vmem:[%s312_s1] sm:$0xff]  ;;  %212 = vmatpush3.msk.msra.mxu0 %vm33_vm0, %v21_v0  ;;  %225 = vset.pattern.permute.xlu0 %v252_v4 }
   0x3   :  { %v23_v3 = vld [vmem:[%s313_s2] sm:$0xff] }
   0x4   :  { %10 = vsyncpa [#allocation3], 0  ;;  %214 = vmatmul.mubr.msk.f32.vlgmr.msra.gmra.mrb[0].mxu0 %vm29_vm2, %v22_v1  ;;  %26 = vperm.xlu0 %225, %v23_v3   ;;  %v109_v5 = vld [vmem:[%s315_s4] sm:$0x3]  ;;  %vm115_vm3 = vcmask 64512   ;;  %s253_s25 = smov [#allocation2]  }
   0x5   :  { %216 = vmatprep.subr.mxu1 %v250_v2  ;;  %218 = vmatprep.mubr.msk.f32.mxu1 %vm251_vm1, %v250_v2  ;;  %v108_v11 = vld [vmem:[%s314_s3] sm:$0x3]  ;;  %s196_s26 = sshll.u32 %s253_s25, 4  ;;  %s197_s26 = int_to_ptr.vmem [resolvable:$true] %s196_s26 }
   0x6   :  { %s226_s4 = scalar_lea.vmem %s197_s26, 32  ;;  %p231_p1 = scmp.lt.s32.totalorder %s197_s26, %s197_s26 }
   0x7   :  { %p227_p0 = scmp.ne.s32.totalorder %s197_s26, %s226_s4  ;;  %p232_p2 = scmp.lt.s32.totalorder %s226_s4, %s226_s4 }
   0x8   :  { %112 = vperm.xlu0 %225, %v109_v5  }
   0x9   :  { %p233_p3 = por %p232_p2, %p231_p1 }
   0xb   :  { %p234_p4 = pnand %p233_p3, %p227_p0 }
  0x83   :  { %v27_v6 = vpop.permute.xlu0 %26 }
  0x87   :  { %v113_v12 = vpop.permute.xlu0 %112 }
  0xd7   :  { %v103_v7 = vpop.f32.mrb[0].mxu0 }
  0xd8   :  { %v104_v8 = vadd.f32 %v103_v7, %v27_v6  ;;  %v215_v9 = vpop.f32.mrb[1].mxu0 }
  0xda   :  { %v107_v10 = vmax.f32 %v104_v8, 0.0 }
  0xdc   :  { %217 = vmatpush3.msra.mxu1 %v107_v10 }
  0xdd   :  { %219 = vmatmul.mubr.msk.f32.vlgmr.msra.gmra.mrb[0].mxu1 %vm115_vm3, %v108_v11 }
 0x1b0   :  { %v185_v13 = vpop.f32.mrb[0].mxu1 }
 0x1b1   :  { %v186_v14 = vadd.f32 %v185_v13, %v113_v12  ;;  %v220_v15 = vpop.f32.mrb[1].mxu1 }
 0x1b3   :  { %189 = vst [vmem:[#allocation2] sm:$0x3] %v186_v14 }
 0x1b4   :  { %237 = shalt.err (!%p234_p4)
}
 0x1b5   :  { %s238_s28 = scalar_lea.hbm %s316_s5, 32 }
 0x1b6   :  { %p239_p5 = scmp.ne.s32.totalorder %s316_s5, %s238_s28  ;;  %p242_p6 = scmp.lt.u32.totalorder %s238_s28, %s316_s5 }
 0x1b8   :  { %p244_p7 = pnand %p242_p6, %p239_p5 }
 0x1ba   :  { %247 = shalt.err (!%p244_p7)
}
 0x1bb   :  { %199 = dma.vmem_to_hbm [thread:$0]  %s197_s26, 32, %s316_s5, [#allocation3]  }
 0x1bc   :  { %248 = dma.done.wait [#allocation3], 32  }
 0x1bd   :  { %249 = vsyncadd [#allocation3], 4294967264 }
 0x1be   :  { %203 = vsyncpa [#allocation3], 1 }

</bundles_post_ra>
